<compile_context>
chip_gen: v5e
topology: v5e:2x2
jax: 0.10.0
libtpu: 0.0.40
codegen_flags: <defaults>
</compile_context>

<pallas_src>
import jax
import jax.numpy as jnp
from jax.experimental import pallas as pl
from jax.experimental.pallas import tpu as pltpu


def _round_up(x: int, m: int) -> int:
    return (x + m - 1) // m * m


def _swiglu_ffn_kernel(x_ref, w1_ref, w2_ref, b1_ref, b2_ref, w3_ref, b3_ref, o_ref):
    # x_ref : (TM, Cin_p)  bf16
    # w1/w2 : (Cin_p, H_p) bf16       b1/b2 : (1, H_p)  f32
    # w3    : (H_p, Cout_p) bf16      b3    : (1, Cout_p) f32
    # o_ref : (TM, Cout_p)  x.dtype
    x = x_ref[...]

    # First projection: w12 is pre-split into the x1 / x2 column halves, so the
    # torch chunk(2, dim=-1) costs nothing in-kernel.  bf16 MXU inputs, f32 acc.
    x1 = jnp.dot(x, w1_ref[...], preferred_element_type=jnp.float32) + b1_ref[...]
    x2 = jnp.dot(x, w2_ref[...], preferred_element_type=jnp.float32) + b2_ref[...]

    # SwiGLU gate in f32 (sigmoid on the EUP, muls on the VPU).
    hidden = (x1 * jax.nn.sigmoid(x1)) * x2

    # Output projection: cast the activation back to bf16 for the MXU, f32 acc.
    out = jnp.dot(hidden.astype(w3_ref.dtype), w3_ref[...],
                  preferred_element_type=jnp.float32) + b3_ref[...]
    o_ref[...] = out.astype(o_ref.dtype)


def prepare_swiglu_params(w12, b12, w3, b3, *, hidden_features,
                          mxu_dtype=jnp.bfloat16, lane=128):
    """One-time prep of torch-layout weights: transpose to (in, out), split the
    w12 output columns into the x1/x2 halves, pad to lane multiples, cast to bf16.

    torch layout: w12 (2H, Cin), b12 (2H,), w3 (Cout, H), b3 (Cout,).
    """
    two_h, c_in = w12.shape
    h = hidden_features
    assert two_h == 2 * h
    c_out, h2 = w3.shape
    assert h2 == h

    c_in_p = _round_up(c_in, lane)
    h_p = _round_up(h, lane)
    c_out_p = _round_up(c_out, lane)

    w1 = jnp.transpose(w12[:h])          # (Cin, H)   -> x1 path
    w2 = jnp.transpose(w12[h:])          # (Cin, H)   -> x2 path
    b1 = b12[:h].reshape(1, h)
    b2 = b12[h:].reshape(1, h)
    w3_t = jnp.transpose(w3)             # (H, Cout)
    b3_2 = b3.reshape(1, c_out)

    def pad2(a, rows, cols):
        return jnp.pad(a, ((0, rows - a.shape[0]), (0, cols - a.shape[1])))

    return dict(
        w1=pad2(w1, c_in_p, h_p).astype(mxu_dtype),
        w2=pad2(w2, c_in_p, h_p).astype(mxu_dtype),
        b1=pad2(b1, 1, h_p).astype(jnp.float32),
        b2=pad2(b2, 1, h_p).astype(jnp.float32),
        w3=pad2(w3_t, h_p, c_out_p).astype(mxu_dtype),
        b3=pad2(b3_2, 1, c_out_p).astype(jnp.float32),
        c_in=c_in, c_out=c_out,
        c_in_p=c_in_p, h_p=h_p, c_out_p=c_out_p,
        mxu_dtype=mxu_dtype,
    )


def swiglu_ffn_pallas(x, params, *, row_tile=256):
    """x: (..., C_in). Returns (..., C_out)."""
    orig_shape = x.shape
    c_in, c_out = params["c_in"], params["c_out"]
    c_in_p, h_p, c_out_p = params["c_in_p"], params["h_p"], params["c_out_p"]
    assert orig_shape[-1] == c_in

    m = 1
    for d in orig_shape[:-1]:
        m *= d
    x2d = x.reshape(m, c_in)

    # Row tile: multiple of 8 (sublane); pad the token count up to a tile multiple.
    tm = min(row_tile, _round_up(m, 8))
    m_p = _round_up(m, tm)

    x_pad = jnp.pad(x2d, ((0, m_p - m), (0, c_in_p - c_in))).astype(params["mxu_dtype"])

    # VMEM budget: resident weights + double-buffered x/out tiles + f32 live
    # intermediates, clamped to stay inside v7x's 64 MiB physical VMEM.
    bpe = jnp.dtype(params["mxu_dtype"]).itemsize
    out_bpe = jnp.dtype(x.dtype).itemsize
    weight_bytes = (2 * c_in_p * h_p + h_p * c_out_p) * bpe + (2 * h_p + c_out_p) * 4
    io_bytes = 2 * tm * (c_in_p * bpe + c_out_p * out_bpe)          # double-buffered
    live_bytes = 3 * tm * h_p * 4 + tm * c_out_p * 4                # x1, x2, hidden, out
    vmem_limit = 2 * (weight_bytes + io_bytes + live_bytes) + (4 << 20)
    vmem_limit = max(32 << 20, min(56 << 20, int(vmem_limit)))

    out_padded = pl.pallas_call(
        _swiglu_ffn_kernel,
        out_shape=jax.ShapeDtypeStruct((m_p, c_out_p), x.dtype),
        grid_spec=pltpu.PrefetchScalarGridSpec(
            num_scalar_prefetch=0,
            grid=(m_p // tm,),
            in_specs=[
                pl.BlockSpec((tm, c_in_p), lambda i: (i, 0)),       # x row tile
                pl.BlockSpec((c_in_p, h_p), lambda i: (0, 0)),      # w1 (resident)
                pl.BlockSpec((c_in_p, h_p), lambda i: (0, 0)),      # w2 (resident)
                pl.BlockSpec((1, h_p), lambda i: (0, 0)),           # b1
                pl.BlockSpec((1, h_p), lambda i: (0, 0)),           # b2
                pl.BlockSpec((h_p, c_out_p), lambda i: (0, 0)),     # w3 (resident)
                pl.BlockSpec((1, c_out_p), lambda i: (0, 0)),       # b3
            ],
            out_specs=pl.BlockSpec((tm, c_out_p), lambda i: (i, 0)),
        ),
        compiler_params=pltpu.CompilerParams(
            dimension_semantics=("parallel",),
            vmem_limit_bytes=vmem_limit,
        ),
    )(x_pad, params["w1"], params["w2"], params["b1"], params["b2"],
      params["w3"], params["b3"])

    return out_padded[:m, :c_out].reshape(*orig_shape[:-1], c_out)


def swiglu_ffn_reference(x, w12, b12, w3, b3):
    """Pure-JAX reference matching the PyTorch forward exactly (f32)."""
    h = w12.shape[0] // 2
    x12 = jnp.einsum("...c,oc->...o", x, w12) + b12
    x1, x2 = x12[..., :h], x12[..., h:]
    hidden = jax.nn.silu(x1) * x2
    return jnp.einsum("...c,oc->...o", hidden, w3) + b3


if __name__ == "__main__":
    # Small shapes consistent with the module: tokens (B, N, C_in), hidden H.
    B, N, C = 2, 8, 32
    H = 64

    key = jax.random.PRNGKey(0)
    kx, kw12, kb12, kw3, kb3 = jax.random.split(key, 5)

    x = jax.random.normal(kx, (B, N, C), dtype=jnp.float32)
    # Deterministic synthetic parameters in torch nn.Linear layout (out, in).
    w12 = jax.random.normal(kw12, (2 * H, C), dtype=jnp.float32) * (1.0 / jnp.sqrt(C))
    b12 = jax.random.normal(kb12, (2 * H,), dtype=jnp.float32) * 0.1
    w3 = jax.random.normal(kw3, (C, H), dtype=jnp.float32) * (1.0 / jnp.sqrt(H))
    b3 = jax.random.normal(kb3, (C,), dtype=jnp.float32) * 0.1

    params = prepare_swiglu_params(w12, b12, w3, b3, hidden_features=H)

    out = swiglu_ffn_pallas(x, params)
    out = jax.block_until_ready(out)

    ref = swiglu_ffn_reference(x, w12, b12, w3, b3)
    assert out.shape == ref.shape
    max_err = jnp.max(jnp.abs(out - ref))
    # bf16 MXU inputs with f32 accumulation -> ~1e-2 scale error vs f32 reference.
    assert jnp.allclose(out, ref, atol=7.5e-2, rtol=5e-2), f"max abs err {max_err}"
    print("KERNEL_OK")
</pallas_src>

<mosaic_0001>
module attributes {stable_mosaic.version = 11 : i64} {
  func.func @_swiglu_ffn_kernel(%arg0: i32, %arg1: memref<16x128xbf16, #tpu.memory_space<vmem>>, %arg2: memref<128x128xbf16, #tpu.memory_space<vmem>>, %arg3: memref<128x128xbf16, #tpu.memory_space<vmem>>, %arg4: memref<1x128xf32, #tpu.memory_space<vmem>>, %arg5: memref<1x128xf32, #tpu.memory_space<vmem>>, %arg6: memref<128x128xbf16, #tpu.memory_space<vmem>>, %arg7: memref<1x128xf32, #tpu.memory_space<vmem>>, %arg8: memref<16x128xf32, #tpu.memory_space<vmem>>) attributes {dimension_semantics = [#tpu.dimension_semantics<parallel>], iteration_bounds = array<i64: 1>, scalar_prefetch = 0 : i64, scratch_operands = 0 : i64, tpu.core_type = #tpu.core_type<tc>, window_params = [{transform_indices = @transform_0, window_bounds = array<i64: 16, 128>}, {pipeline_mode = #tpu.pipeline_mode<synchronous>, transform_indices = @transform_1, window_bounds = array<i64: 128, 128>}, {pipeline_mode = #tpu.pipeline_mode<synchronous>, transform_indices = @transform_2, window_bounds = array<i64: 128, 128>}, {pipeline_mode = #tpu.pipeline_mode<synchronous>, transform_indices = @transform_3, window_bounds = array<i64: 1, 128>}, {pipeline_mode = #tpu.pipeline_mode<synchronous>, transform_indices = @transform_4, window_bounds = array<i64: 1, 128>}, {pipeline_mode = #tpu.pipeline_mode<synchronous>, transform_indices = @transform_5, window_bounds = array<i64: 128, 128>}, {pipeline_mode = #tpu.pipeline_mode<synchronous>, transform_indices = @transform_6, window_bounds = array<i64: 1, 128>}, {transform_indices = @transform_7, window_bounds = array<i64: 16, 128>}]} {
    %c0 = arith.constant 0 : index
    %c0_0 = arith.constant 0 : index
    %0 = vector.load %arg1[%c0, %c0_0] : memref<16x128xbf16, #tpu.memory_space<vmem>>, vector<16x128xbf16>
    %c0_1 = arith.constant 0 : index
    %c0_2 = arith.constant 0 : index
    %1 = vector.load %arg2[%c0_1, %c0_2] : memref<128x128xbf16, #tpu.memory_space<vmem>>, vector<128x128xbf16>
    %cst = arith.constant dense<0.000000e+00> : vector<16x128xf32>
    %2 = tpu.matmul %0, %1, %cst {dimension_numbers = #tpu.dot_dimension_numbers<[1], [0], [0], [1], [0, 0, 1, 1], [], []>} : vector<16x128xbf16>, vector<128x128xbf16>, vector<16x128xf32> -> vector<16x128xf32>
    %c0_3 = arith.constant 0 : index
    %c0_4 = arith.constant 0 : index
    %3 = vector.load %arg4[%c0_3, %c0_4] : memref<1x128xf32, #tpu.memory_space<vmem>>, vector<1x128xf32>
    %4 = vector.broadcast %3 : vector<1x128xf32> to vector<16x128xf32>
    %5 = arith.addf %2, %4 : vector<16x128xf32>
    %c0_5 = arith.constant 0 : index
    %c0_6 = arith.constant 0 : index
    %6 = vector.load %arg3[%c0_5, %c0_6] : memref<128x128xbf16, #tpu.memory_space<vmem>>, vector<128x128xbf16>
    %cst_7 = arith.constant dense<0.000000e+00> : vector<16x128xf32>
    %7 = tpu.matmul %0, %6, %cst_7 {dimension_numbers = #tpu.dot_dimension_numbers<[1], [0], [0], [1], [0, 0, 1, 1], [], []>} : vector<16x128xbf16>, vector<128x128xbf16>, vector<16x128xf32> -> vector<16x128xf32>
    %c0_8 = arith.constant 0 : index
    %c0_9 = arith.constant 0 : index
    %8 = vector.load %arg5[%c0_8, %c0_9] : memref<1x128xf32, #tpu.memory_space<vmem>>, vector<1x128xf32>
    %9 = vector.broadcast %8 : vector<1x128xf32> to vector<16x128xf32>
    %10 = arith.addf %7, %9 : vector<16x128xf32>
    %11 = arith.negf %5 : vector<16x128xf32>
    %12 = math.exp %11 : vector<16x128xf32>
    %cst_10 = arith.constant 1.000000e+00 : f32
    %13 = vector.broadcast %cst_10 : f32 to vector<16x128xf32>
    %14 = arith.addf %13, %12 : vector<16x128xf32>
    %15 = arith.divf %13, %14 : vector<16x128xf32>
    %16 = arith.mulf %5, %15 : vector<16x128xf32>
    %17 = arith.mulf %16, %10 : vector<16x128xf32>
    %18 = arith.truncf %17 : vector<16x128xf32> to vector<16x128xbf16>
    %c0_11 = arith.constant 0 : index
    %c0_12 = arith.constant 0 : index
    %19 = vector.load %arg6[%c0_11, %c0_12] : memref<128x128xbf16, #tpu.memory_space<vmem>>, vector<128x128xbf16>
    %cst_13 = arith.constant dense<0.000000e+00> : vector<16x128xf32>
    %20 = tpu.matmul %18, %19, %cst_13 {dimension_numbers = #tpu.dot_dimension_numbers<[1], [0], [0], [1], [0, 0, 1, 1], [], []>} : vector<16x128xbf16>, vector<128x128xbf16>, vector<16x128xf32> -> vector<16x128xf32>
    %c0_14 = arith.constant 0 : index
    %c0_15 = arith.constant 0 : index
    %21 = vector.load %arg7[%c0_14, %c0_15] : memref<1x128xf32, #tpu.memory_space<vmem>>, vector<1x128xf32>
    %22 = vector.broadcast %21 : vector<1x128xf32> to vector<16x128xf32>
    %23 = arith.addf %20, %22 : vector<16x128xf32>
    %c0_16 = arith.constant 0 : index
    %c0_17 = arith.constant 0 : index
    %24 = vector.load %arg8[%c0_16, %c0_17] : memref<16x128xf32, #tpu.memory_space<vmem>>, vector<16x128xf32>
    tpu.vector_store %arg8[%c0_16, %c0_17], %23 {strides = array<i32>} : memref<16x128xf32, #tpu.memory_space<vmem>>, vector<16x128xf32>,
    return
  }
  func.func @transform_0(%arg0: i32) -> (i32, i32) {
    %c0_i32 = arith.constant 0 : i32
    %c0_i32_0 = arith.constant 0 : i32
    return %arg0, %c0_i32 : i32, i32
  }
  func.func @transform_1(%arg0: i32) -> (i32, i32) {
    %c0_i32 = arith.constant 0 : i32
    %c0_i32_0 = arith.constant 0 : i32
    %c0_i32_1 = arith.constant 0 : i32
    return %c0_i32, %c0_i32_0 : i32, i32
  }
  func.func @transform_2(%arg0: i32) -> (i32, i32) {
    %c0_i32 = arith.constant 0 : i32
    %c0_i32_0 = arith.constant 0 : i32
    %c0_i32_1 = arith.constant 0 : i32
    return %c0_i32, %c0_i32_0 : i32, i32
  }
  func.func @transform_3(%arg0: i32) -> (i32, i32) {
    %c0_i32 = arith.constant 0 : i32
    %c0_i32_0 = arith.constant 0 : i32
    %c0_i32_1 = arith.constant 0 : i32
    return %c0_i32, %c0_i32_0 : i32, i32
  }
  func.func @transform_4(%arg0: i32) -> (i32, i32) {
    %c0_i32 = arith.constant 0 : i32
    %c0_i32_0 = arith.constant 0 : i32
    %c0_i32_1 = arith.constant 0 : i32
    return %c0_i32, %c0_i32_0 : i32, i32
  }
  func.func @transform_5(%arg0: i32) -> (i32, i32) {
    %c0_i32 = arith.constant 0 : i32
    %c0_i32_0 = arith.constant 0 : i32
    %c0_i32_1 = arith.constant 0 : i32
    return %c0_i32, %c0_i32_0 : i32, i32
  }
  func.func @transform_6(%arg0: i32) -> (i32, i32) {
    %c0_i32 = arith.constant 0 : i32
    %c0_i32_0 = arith.constant 0 : i32
    %c0_i32_1 = arith.constant 0 : i32
    return %c0_i32, %c0_i32_0 : i32, i32
  }
  func.func @transform_7(%arg0: i32) -> (i32, i32) {
    %c0_i32 = arith.constant 0 : i32
    %c0_i32_0 = arith.constant 0 : i32
    return %arg0, %c0_i32 : i32, i32
  }
}

</mosaic_0001>

<bundles_post_ra>
// kernel: tpu_custom_call.1
= control target key start
LH: loop header
LB: loop body
LE: loop exit
PB: predicated region body
PF: predicated region fallthrough
CT: control target
= control target key end

     0   :  { %12 = vsyncpa [#allocation3], 0  ;;  %s758_s0 = inlined_call_operand.hbm [shape: bf16[16,128], index: 0, kind: input, shape index: {}]   ;;  %s759_s1 = inlined_call_operand.hbm [shape: bf16[128,128], index: 1, kind: input, shape index: {}]   ;;  %s760_s2 = inlined_call_operand.hbm [shape: bf16[128,128], index: 2, kind: input, shape index: {}]   ;;  %s761_s3 = inlined_call_operand.vmem [shape: f32[1,128], index: 3, kind: input, shape index: {}]   ;;  %s762_s4 = inlined_call_operand.vmem [shape: f32[1,128], index: 4, kind: input, shape index: {}]   ;;  %s763_s5 = inlined_call_operand.hbm [shape: bf16[128,128], index: 5, kind: input, shape index: {}]   ;;  %s764_s6 = inlined_call_operand.vmem [shape: f32[1,128], index: 6, kind: input, shape index: {}]   ;;  %s765_s7 = inlined_call_operand.hbm [shape: f32[16,128], index: 7, kind: output, shape index: {}]  }
   0x1   :  { %13 = vsyncpa [#allocation6], 0 }
   0x2   :  { %14 = vsyncpa [#allocation9], 0 }
   0x3   :  { %15 = vsyncpa [#allocation4], 0  ;;  %s33_s26 = sshll.u32 %s759_s1, 4  ;;  %s685_s27 = smov [#allocation5]   ;;  %s34_s26 = int_to_ptr.hbm [resolvable:$true] %s33_s26 }
   0x4   :  { %s35_s28 = sshll.u32 %s685_s27, 4  ;;  %s20_s8 = sshll.u32 %s758_s0, 4  ;;  %s36_s28 = int_to_ptr.vmem [resolvable:$true] %s35_s28  ;;  %s21_s8 = int_to_ptr.hbm [resolvable:$true] %s20_s8 }
   0x5   :  { %s686_s9 = smov 64   ;;  %s687_s10 = smov 4  }
   0x6   :  { %41 = dma.hbm_to_vmem [thread:$0]  %s34_s26, 1024, %s36_s28, [#allocation6], %s686_s9, %s686_s9, %s687_s10  }
   0x7   :  { %s688_s11 = smov [#allocation2]   ;;  %s46_s15 = sshll.u32 %s760_s2, 4  ;;  %s47_s15 = int_to_ptr.hbm [resolvable:$true] %s46_s15 }
   0x8   :  { %s22_s12 = sshll.u32 %s688_s11, 4  ;;  %s63_s17 = sshll.u32 %s763_s5, 4  ;;  %s23_s12 = int_to_ptr.vmem [resolvable:$true] %s22_s12  ;;  %s64_s17 = int_to_ptr.hbm [resolvable:$true] %s63_s17 }
   0x9   :  { %28 = dma.hbm_to_vmem [thread:$0]  %s21_s8, 128, %s23_s12, [#allocation3], %s686_s9, %s686_s9, %s687_s10  }
   0xa   :  { %s689_s18 = smov [#allocation7]   ;;  %s690_s0 = smov [#allocation8]  }
   0xb   :  { %s48_s19 = sshll.u32 %s689_s18, 4  ;;  %s65_s20 = sshll.u32 %s690_s0, 4  ;;  %s49_s19 = int_to_ptr.vmem [resolvable:$true] %s48_s19  ;;  %s66_s20 = int_to_ptr.vmem [resolvable:$true] %s65_s20 }
   0xc   :  { %54 = dma.hbm_to_vmem [thread:$0]  %s47_s15, 1024, %s49_s19, [#allocation6], %s686_s9, %s686_s9, %s687_s10  }
   0xd   :  { %71 = dma.hbm_to_vmem [thread:$0]  %s64_s17, 1024, %s66_s20, [#allocation9], %s686_s9, %s686_s9, %s687_s10  }
   0xe   :  { %677 = dma.done.wait [#allocation3], 128  }
   0xf   :  { %678 = vsyncadd [#allocation3], 4294967168 }
  0x10   :  { %679 = dma.done.wait [#allocation6], 2048  }
  0x11   :  { %680 = vsyncadd [#allocation6], 4294965248 }
  0x12   :  { %681 = dma.done.wait [#allocation9], 1024  }
  0x13   :  { %682 = vsyncadd [#allocation9], 4294966272  ;;  %v520_v0 = vld [vmem:[#allocation5 + $0x38] sm:$0xff]  ;;  %v519_v1 = vld [vmem:[#allocation5 + $0x30] sm:$0xff]  ;;  %s395_s27 = sshll.u32 %s765_s7, 4  ;;  %s692_s28 = smov 128   ;;  %s396_s27 = int_to_ptr.hbm [resolvable:$true] %s395_s27 }
  0x14   :  { %166 = vmatpush.bf16.msra.mxu0 %v520_v0  ;;  %v528_v2 = vld [vmem:[#allocation7 + $0x38] sm:$0xff]  ;;  %v527_v3 = vld [vmem:[#allocation7 + $0x30] sm:$0xff]  ;;  %v518_v4 = vld [vmem:[#allocation5 + $0x28] sm:$0xff]  ;;  %s693_s29 = smov 8  }
  0x15   :  { %248 = vmatpush.bf16.msra.mxu1 %v528_v2  ;;  %v526_v5 = vld [vmem:[#allocation7 + $0x28] sm:$0xff]  ;;  %v517_v6 = vld [vmem:[#allocation5 + $0x20] sm:$0xff]  ;;  %v516_v8 = vld [vmem:[#allocation5 + $0x18] sm:$0xff] }
  0x16   :  { %v525_v7 = vld [vmem:[#allocation7 + $0x20] sm:$0xff]  ;;  %v524_v9 = vld [vmem:[#allocation7 + $0x18] sm:$0xff]  ;;  %v515_v10 = vld [vmem:[#allocation5 + $0x10] sm:$0xff] }
  0x17   :  { %v523_v11 = vld [vmem:[#allocation7 + $0x10] sm:$0xff]  ;;  %v514_v12 = vld [vmem:[#allocation5 + $0x8] sm:$0xff]  ;;  %v513_v14 = vld [vmem:[#allocation5] sm:$0xff] }
  0x18   :  { %167 = vmatpush.bf16.msra.mxu0 %v519_v1  ;;  %v522_v13 = vld [vmem:[#allocation7 + $0x8] sm:$0xff]  ;;  %v521_v15 = vld [vmem:[#allocation7] sm:$0xff]  ;;  %v512_v16 = vld [vmem:[#allocation2] sm:$0xff] }
  0x19   :  { %249 = vmatpush.bf16.msra.mxu1 %v527_v3  ;;  %v536_v17 = vld [vmem:[#allocation8 + $0x38] sm:$0xff]  ;;  %v535_v18 = vld [vmem:[#allocation8 + $0x30] sm:$0xff]  ;;  %v534_v19 = vld [vmem:[#allocation8 + $0x28] sm:$0xff] }
  0x1a   :  { %373 = vmatpush.bf16.msra.mxu2 %v536_v17  ;;  %v533_v20 = vld [vmem:[#allocation8 + $0x20] sm:$0xff]  ;;  %v532_v21 = vld [vmem:[#allocation8 + $0x18] sm:$0xff]  ;;  %v531_v24 = vld [vmem:[#allocation8 + $0x10] sm:$0xff] }
  0x1b   :  { %v546_v22 = vld [vmem:[%s761_s3] ss:$0 sm:$0xff]  ;;  %v530_v27 = vld [vmem:[#allocation8 + $0x8] sm:$0xff]  ;;  %v529_v29 = vld [vmem:[#allocation8] sm:$0xff] }
  0x1c   :  { %168 = vmatpush.bf16.msra.mxu0 %v518_v4  ;;  %v547_v52 = vld [vmem:[%s762_s4] ss:$0 sm:$0xff]  ;;  %s691_s4 = smov [#allocation10]  }
  0x1d   :  { %250 = vmatpush.bf16.msra.mxu1 %v526_v5  ;;  %v548_v2 = vld [vmem:[%s764_s6] ss:$0 sm:$0xff]  ;;  %s393_s24 = sshll.u32 %s691_s4, 4  ;;  %s394_s24 = int_to_ptr.vmem [resolvable:$true] %s393_s24 }
  0x1e   :  { %374 = vmatpush.bf16.msra.mxu2 %v535_v18 }
  0x20   :  { %169 = vmatpush.bf16.msra.mxu0 %v517_v6 }
  0x21   :  { %251 = vmatpush.bf16.msra.mxu1 %v525_v7 }
  0x22   :  { %375 = vmatpush.bf16.msra.mxu2 %v534_v19 }
  0x24   :  { %170 = vmatpush.bf16.msra.mxu0 %v516_v8 }
  0x25   :  { %252 = vmatpush.bf16.msra.mxu1 %v524_v9 }
  0x26   :  { %376 = vmatpush.bf16.msra.mxu2 %v533_v20 }
  0x28   :  { %171 = vmatpush.bf16.msra.mxu0 %v515_v10 }
  0x29   :  { %253 = vmatpush.bf16.msra.mxu1 %v523_v11 }
  0x2a   :  { %377 = vmatpush.bf16.msra.mxu2 %v532_v21 }
  0x2c   :  { %172 = vmatpush.bf16.msra.mxu0 %v514_v12 }
  0x2d   :  { %254 = vmatpush.bf16.msra.mxu1 %v522_v13 }
  0x2e   :  { %378 = vmatpush.bf16.msra.mxu2 %v531_v24 }
  0x30   :  { %173 = vmatpush.bf16.msra.mxu0 %v513_v14 }
  0x31   :  { %255 = vmatpush.bf16.msra.mxu1 %v521_v15 }
  0x32   :  { %379 = vmatpush.bf16.msra.mxu2 %v530_v27 }
  0x33   :  { %174 = vmatmul.bf16.vlgmr.msra.gmra.mxu0 %v512_v16 }
  0x34   :  { %256 = vmatmul.bf16.vlgmr.msra.gmra.mxu1 %v512_v16 }
  0x36   :  { %380 = vmatpush.bf16.msra.mxu2 %v529_v29 }
  0xb0   :  { %v175_v23 = vpop.f32.mrf.mxu0 }
  0xb1   :  { %v176_v25 = vadd.f32 %v546_v22, %v175_v23  ;;  %v257_v40 = vpop.f32.mrf.mxu1 }
  0xb2   :  { %v258_v59 = vadd.f32 %v547_v52, %v257_v40 }
  0xb3   :  { %v478_v26 = vmul.f32 -1.442695, %v176_v25 }
  0xb5   :  { %549 = vpow2.f32 %v478_v26 }
  0xb8   :  { %v177_v28 = vpop.f32.mrf.mxu0 }
  0xb9   :  { %v178_v30 = vadd.f32 %v546_v22, %v177_v28  ;;  %v259_v56 = vpop.f32.mrf.mxu1 }
  0xba   :  { %v260_v62 = vadd.f32 %v547_v52, %v259_v56 }
  0xbb   :  { %v550_v31 = vpop.eup %549  ;;  %v479_v32 = vmul.f32 -1.442695, %v178_v30 }
  0xbc   :  { %v268_v33 = vadd.f32 1.0, %v550_v31 }
  0xbd   :  { %551 = vpow2.f32 %v479_v32 }
  0xbe   :  { %553 = vrcp.f32 %v268_v33  ;;  %v281_v43 = vand.u32 2147483648, %v268_v33  ;;  %vm275_vm1 = vweird.f32 %v268_v33  ;;  %v279_v44 = vand.u32 2147483647, %v268_v33 }
  0xc0   :  { %v282_v48 = vor.u32 1.1754944e-38, %v281_v43  ;;  %vm280_vm3 = vcmp.eq.f32.partialorder %v279_v44, 8.507059e+37 }
  0xc3   :  { %v552_v34 = vpop.eup %551 }
  0xc4   :  { %v554_v35 = vpop.eup %553  ;;  %v269_v36 = vadd.f32 1.0, %v552_v34 }
  0xc5   :  { %v271_v37 = vmul.f32 %v554_v35, %v268_v33  ;;  %vm276_vm0 = vweird.f32 %v554_v35 }
  0xc6   :  { %555 = vrcp.f32 %v269_v36  ;;  %vm277_vm2 = vmor %vm275_vm1, %vm276_vm0  ;;  %v296_v49 = vand.u32 2147483648, %v269_v36  ;;  %v294_v51 = vand.u32 2147483647, %v269_v36  ;;  %vm290_vm5 = vweird.f32 %v269_v36 }
  0xc7   :  { %v272_v38 = vsub.f32 1.0, %v271_v37 }
  0xc8   :  { %v297_v55 = vor.u32 1.1754944e-38, %v296_v49  ;;  %vm295_vm7 = vcmp.eq.f32.partialorder %v294_v51, 8.507059e+37 }
  0xc9   :  { %v273_v39 = vmul.f32 %v554_v35, %v272_v38 }
  0xcb   :  { %v274_v41 = vadd.f32 %v554_v35, %v273_v39 }
  0xcc   :  { %v556_v42 = vpop.eup %555 }
  0xcd   :  { %v286_v45 = vmul.f32 %v556_v42, %v269_v36  ;;  %v278_v46 = vsel %vm277_vm2, %v554_v35, %v274_v41  ;;  %vm291_vm4 = vweird.f32 %v556_v42 }
  0xce   :  { %v283_v53 = vsel %vm280_vm3, %v282_v48, %v278_v46  ;;  %vm292_vm6 = vmor %vm290_vm5, %vm291_vm4 }
  0xcf   :  { %v287_v47 = vsub.f32 1.0, %v286_v45  ;;  %v300_v57 = vmul.f32 %v283_v53, %v176_v25 }
  0xd1   :  { %v288_v50 = vmul.f32 %v556_v42, %v287_v47  ;;  %v302_v63 = vmul.f32 %v300_v57, %v258_v59 }
  0xd3   :  { %v289_v54 = vadd.f32 %v556_v42, %v288_v50 }
  0xd5   :  { %v293_v58 = vsel %vm292_vm6, %v556_v42, %v289_v54 }
  0xd6   :  { %v298_v60 = vsel %vm295_vm7, %v297_v55, %v293_v58 }
  0xd7   :  { %v301_v61 = vmul.f32 %v298_v60, %v178_v30 }
  0xd9   :  { %v303_v0 = vmul.f32 %v301_v61, %v260_v62 }
  0xdb   :  { %v304_v1 = vpack.c.bf16 %v303_v0, %v302_v63 }
  0xdd   :  { %381 = vmatmul.bf16.vlgmr.msra.gmra.mxu2 %v304_v1 }
 0x160   :  { %v382_v3 = vpop.f32.mrf.mxu2 }
 0x161   :  { %v383_v4 = vadd.f32 %v548_v2, %v382_v3 }
 0x163   :  { %387 = vst [vmem:[#allocation10] sm:$0xff] %v383_v4 }
 0x168   :  { %v384_v5 = vpop.f32.mrf.mxu2 }
 0x169   :  { %v385_v6 = vadd.f32 %v548_v2, %v384_v5 }
 0x16b   :  { %388 = vst [vmem:[#allocation10 + $0x8] sm:$0xff] %v385_v6 }
 0x16c   :  { %401 = dma.vmem_to_hbm [thread:$0]  %s394_s24, 256, %s396_s27, [#allocation4], %s692_s28, %s692_s28, %s693_s29  }
 0x16d   :  { %683 = dma.done.wait [#allocation4], 256  }
 0x16e   :  { %684 = vsyncadd [#allocation4], 4294967040 }
 0x16f   :  { %406 = vsyncpa [#allocation3], 1 }
 0x170   :  { %407 = vsyncpa [#allocation6], 1 }
 0x171   :  { %408 = vsyncpa [#allocation9], 1 }
 0x172   :  { %409 = vsyncpa [#allocation4], 1 }

</bundles_post_ra>
